<compile_context>
chip_gen: v5e
topology: v5e:2x2
jax: 0.10.0
libtpu: 0.0.40
codegen_flags: <defaults>
</compile_context>

<pallas_src>
import jax
import jax.numpy as jnp
import numpy as np
from jax.experimental import pallas as pl
from jax.experimental.pallas import tpu as pltpu

ROWS = 1
OUT_LEN = 256           # max combined string length (lane dim, multiple of 128)
POP_LEN = len("mom")    # static: last element pushed into MyStackClass(['hi','mom'])


def _concat_kernel(popped_ref, s_ref, out_ref):
    """out[0, :] = popped_codes ++ s_codes (char-code concatenation).

    `s` is zero-padded past len(s) and POP_LEN + len(s) <= OUT_LEN, so rotating
    s right by POP_LEN lanes wraps only zeros into lanes [0, POP_LEN); `popped`
    is zero at lanes >= POP_LEN, so a plain int32 add realizes the concat.
    """
    rolled = pltpu.roll(s_ref[...], shift=POP_LEN, axis=1)  # static XLU lane rotation
    out_ref[...] = popped_ref[...] + rolled


@jax.jit
def concat_strings_kernel(popped_codes, s_codes):
    return pl.pallas_call(
        _concat_kernel,
        out_shape=jax.ShapeDtypeStruct((ROWS, OUT_LEN), jnp.int32),
        in_specs=[
            pl.BlockSpec(memory_space=pltpu.MemorySpace.VMEM),
            pl.BlockSpec(memory_space=pltpu.MemorySpace.VMEM),
        ],
        out_specs=pl.BlockSpec(memory_space=pltpu.MemorySpace.VMEM),
        input_output_aliases={0: 0},   # reuse the popped buffer as the output
    )(popped_codes, s_codes)


def encode(string: str) -> np.ndarray:
    """Host-side: fixed-width int32 char-code buffer, zero-padded."""
    buf = np.zeros((ROWS, OUT_LEN), dtype=np.int32)
    if string:
        buf[0, : len(string)] = np.frombuffer(string.encode("ascii"), dtype=np.uint8)
    return buf


def foo_forward(s: str) -> str:
    # TODO(synk): torch.classes.my_classes.MyStackClass (custom C++ TorchScript
    # class) has no Pallas equivalent; its observable effect here — pop()
    # returning the last pushed element 'mom' — is reproduced directly, and the
    # string concatenation itself runs in the Pallas kernel on char-code buffers.
    stack = ["hi", "mom"]
    popped = stack.pop()  # 'mom'
    assert len(popped) == POP_LEN
    assert POP_LEN + len(s) <= OUT_LEN

    out = concat_strings_kernel(jnp.asarray(encode(popped)), jnp.asarray(encode(s)))
    out = jax.block_until_ready(out)
    codes = np.asarray(out)[0, : POP_LEN + len(s)]        # one bulk D2H transfer
    return "".join(chr(int(c)) for c in codes.tolist())


if __name__ == "__main__":
    # Deterministic "random" input string of length 8 (lowercase ascii).
    key = jax.random.PRNGKey(0)
    rand_codes = jax.random.randint(key, (8,), 97, 123)
    s = "".join(chr(int(c)) for c in np.asarray(rand_codes).tolist())

    result = foo_forward(s)
    expected = "mom" + s
    assert result == expected, (result, expected)
    print("KERNEL_OK")
</pallas_src>

<mosaic_0001>
module attributes {stable_mosaic.version = 11 : i64} {
  func.func @_concat_kernel(%arg0: memref<1x256xi32, #tpu.memory_space<vmem>>, %arg1: memref<1x256xi32, #tpu.memory_space<vmem>>, %arg2: memref<1x256xi32, #tpu.memory_space<vmem>>) attributes {dimension_semantics = [], scalar_prefetch = 0 : i64, scratch_operands = 0 : i64, tpu.core_type = #tpu.core_type<tc>} {
    %c0 = arith.constant 0 : index
    %c0_0 = arith.constant 0 : index
    %0 = vector.load %arg1[%c0, %c0_0] : memref<1x256xi32, #tpu.memory_space<vmem>>, vector<1x256xi32>
    %c3_i32 = arith.constant 3 : i32
    %1 = tpu.dynamic_rotate %0 by %c3_i32 dim 1 : vector<1x256xi32>, i32 -> vector<1x256xi32>
    %c0_1 = arith.constant 0 : index
    %c0_2 = arith.constant 0 : index
    %2 = vector.load %arg0[%c0_1, %c0_2] : memref<1x256xi32, #tpu.memory_space<vmem>>, vector<1x256xi32>
    %3 = arith.addi %2, %1 : vector<1x256xi32>
    %c0_3 = arith.constant 0 : index
    %c0_4 = arith.constant 0 : index
    %4 = vector.load %arg2[%c0_3, %c0_4] : memref<1x256xi32, #tpu.memory_space<vmem>>, vector<1x256xi32>
    tpu.vector_store %arg2[%c0_3, %c0_4], %3 {strides = array<i32>} : memref<1x256xi32, #tpu.memory_space<vmem>>, vector<1x256xi32>,
    return
  }
}

</mosaic_0001>

<bundles_post_ra>
// kernel: concat_strings_kernel.1
= control target key start
LH: loop header
LB: loop body
LE: loop exit
PB: predicated region body
PF: predicated region fallthrough
CT: control target
= control target key end

     0   :  { %7 = vsyncpa [#allocation3], 0  ;;  %s147_s0 = inlined_call_operand.hbm [shape: s32[1,256], index: 0, kind: input, shape index: {}, may-alias: {0,2}]   ;;  %s148_s1 = inlined_call_operand.vmem [shape: s32[1,256], index: 1, kind: input, shape index: {}]   ;;  %s149_s2 = inlined_call_operand.hbm [shape: s32[1,256], index: 2, kind: output, shape index: {}, may-alias: {0,2}]  }
   0x1   :  { %8 = vsyncpa [#allocation4], 0  ;;  %s14_s11 = sshll.u32 %s147_s0, 4  ;;  %s120_s12 = smov [#allocation2]   ;;  %s15_s11 = int_to_ptr.hbm [resolvable:$true] %s14_s11 }
   0x2   :  { %s16_s13 = sshll.u32 %s120_s12, 4  ;;  %s17_s13 = int_to_ptr.vmem [resolvable:$true] %s16_s13 }
   0x3   :  { %19 = dma.hbm_to_vmem [thread:$0]  %s15_s11, 32, %s17_s13, [#allocation3]  }
   0x4   :  { %116 = dma.done.wait [#allocation3], 32  }
   0x5   :  { %117 = vsyncadd [#allocation3], 4294967264  ;;  %v26_v0 = vld [vmem:[%s148_s1] sm:$0x3]  ;;  %s121_s16 = smov 3   ;;  %v33_v3 = vlaneseq  ;;  %vm40_vm1 = vcmask 1040384  }
   0x6   :  { %v27_v1 = vperm.slane %v26_v0, 0  ;;  %v28_v2 = vperm.slane %v26_v0, 1  ;;  %v38_v8 = vld [vmem:[#allocation2] sm:$0x3]  ;;  %s122_s0 = smov [#allocation5]   ;;  %s55_s1 = sshll.u32 %s149_s2, 4  ;;  %s56_s1 = int_to_ptr.hbm [resolvable:$true] %s55_s1 }
   0x7   :  { %v34_v5 = vand.u32 127, %v33_v3  ;;  %s53_s17 = sshll.u32 %s122_s0, 4  ;;  %vm45_vm2 = vcmp.lt.s32.totalorder %v33_v3, 256  ;;  %s54_s17 = int_to_ptr.vmem [resolvable:$true] %s53_s17 }
   0x8   :  { %29 = vrot.lane.b32.xlu0 %v27_v1, %s121_s16 }
   0x9   :  { %vm35_vm0 = vcmp.lt.s32.totalorder %v34_v5, 3 }
  0x10   :  { %31 = vrot.lane.b32.xlu0 %v28_v2, %s121_s16 }
  0x7a   :  { %v30_v4 = vpop.permute.xlu0 %29 }
  0x82   :  { %v32_v6 = vpop.permute.xlu0 %31 }
  0x83   :  { %v36_v7 = vsel %vm35_vm0, %v30_v4, %v32_v6  ;;  %v37_v10 = vsel %vm35_vm0, %v32_v6, %v30_v4 }
  0x84   :  { %v39_v9 = vrot.slane %v36_v7, 7 }
  0x86   :  { %v41_v11 = vsel %vm40_vm1, %v37_v10, %v39_v9 }
  0x87   :  { %v42_v12 = vadd.s32 %v41_v11, %v38_v8 }
  0x89   :  { %47 = vst.msk [vmem:[#allocation5] sm:$0x3] %vm45_vm2, %v42_v12 }
  0x8a   :  { %58 = dma.vmem_to_hbm [thread:$0]  %s54_s17, 32, %s56_s1, [#allocation4]  }
  0x8b   :  { %118 = dma.done.wait [#allocation4], 32  }
  0x8c   :  { %119 = vsyncadd [#allocation4], 4294967264 }
  0x8d   :  { %63 = vsyncpa [#allocation3], 1 }
  0x8e   :  { %64 = vsyncpa [#allocation4], 1 }

</bundles_post_ra>
